<compile_context>
chip_gen: v6e
topology: v6e:2x2x1
jax: 0.10.0
libtpu: 0.0.40
codegen_flags: <defaults>
</compile_context>

<pallas_src>
import jax
import jax.numpy as jnp
from jax.experimental import pallas as pl
from jax.experimental.pallas import tpu as pltpu

LANE = 128
MAX_TM = 256          # max batch-tile rows
SUBLANE_BF16 = 16     # bf16 sublane packing granularity


def _cdiv(a, b):
    return -(-a // b)


def _round_up(x, m):
    return _cdiv(x, m) * m


def mlp_kernel(x_ref, w1_ref, b1_ref, w2_ref, b2_ref, w3_ref, b3_ref, o_ref):
    # Cast the activation tile to bf16 in-kernel (VPU) so the wrapper does not
    # pay a separate HBM round-trip for the cast.
    x = x_ref[...].astype(jnp.bfloat16)
    # fc1 + ReLU (bf16 operands, f32 accumulation on the MXU)
    h1 = jnp.dot(x, w1_ref[...], preferred_element_type=jnp.float32)
    h1 = jnp.maximum(h1 + b1_ref[...], 0.0)
    # dropout == identity (eval/inference mode)
    # fc2 + ReLU
    h2 = jnp.dot(h1.astype(jnp.bfloat16), w2_ref[...],
                 preferred_element_type=jnp.float32)
    h2 = jnp.maximum(h2 + b2_ref[...], 0.0)
    # fc3 (no activation); output slab is lane-dense (out cols padded to 128)
    out = jnp.dot(h2.astype(jnp.bfloat16), w3_ref[...],
                  preferred_element_type=jnp.float32) + b3_ref[...]
    o_ref[...] = out.astype(o_ref.dtype)


def prepare_params(w1, b1, w2, b2, w3, b3):
    """One-time parameter preprocessing (hoisted off the per-call path).

    Weights are stored transposed vs. PyTorch, i.e. (in, out); biases (1, out).
    Pads fc3's output columns to a lane-dense multiple of 128 (zero cols) and
    casts the weight matrices to bf16. Returns (params_tuple, out_dim).
    """
    out_dim = w3.shape[1]
    out_pad = _round_up(out_dim, LANE)
    if out_pad != out_dim:
        w3 = jnp.pad(w3, ((0, 0), (0, out_pad - out_dim)))
        b3 = jnp.pad(b3, ((0, 0), (0, out_pad - out_dim)))
    params = (
        w1.astype(jnp.bfloat16), b1.astype(jnp.float32),
        w2.astype(jnp.bfloat16), b2.astype(jnp.float32),
        w3.astype(jnp.bfloat16), b3.astype(jnp.float32),
    )
    return params, out_dim


def _resident_spec(shape, weight_bytes_total):
    """BlockSpec for a slab whose index_map is constant across the grid.

    When the resident weight footprint is large (it scales with hidden size, and
    v7x only has 64 MiB VMEM / 32 MiB default scoped), request single-buffering
    so default double-buffering doesn't double it. For the small test shapes the
    plain (default) BlockSpec is used.
    """
    idx = lambda i: (0, 0)
    if weight_bytes_total > (8 << 20) and hasattr(pl, "Buffered"):
        try:
            return pl.BlockSpec(shape, idx, pipeline_mode=pl.Buffered(1))
        except (TypeError, ValueError):
            pass  # older API: fall back to default (double-buffered)
    return pl.BlockSpec(shape, idx)


def simple_model_forward(x, params, out_dim, *, training=False):
    """Fused forward pass. x: (B, in_dim) f32; params from prepare_params()."""
    if training:
        # TODO(synk): training-mode dropout (p=0.2) not implemented.
        raise NotImplementedError("SimpleModel Pallas kernel is eval/inference only.")

    w1, b1, w2, b2, w3, b3 = params
    B, in_dim = x.shape
    hid = w1.shape[1]
    out_pad = w3.shape[1]

    # Balanced batch tiling: <=256 rows/tile, >=2 tiles once B >= 256 so the
    # batch axis shards across v7x's two TensorCores ("parallel" grid axis);
    # tile rounded to 16 rows for bf16 sublane packing. Tiles are balanced so
    # the last one is never mostly zero padding (B=260 -> 2x144, not 256+256).
    n_tiles = max(_cdiv(B, MAX_TM), 2) if B >= MAX_TM else 1
    tm = _round_up(_cdiv(B, n_tiles), SUBLANE_BF16)
    Bp = _round_up(B, tm)
    grid = (Bp // tm,)
    if Bp != B:
        # Zero rows are safe: the MLP is strictly row-independent and padded
        # rows are sliced off at the end.
        x = jnp.pad(x, ((0, Bp - B), (0, 0)))

    weight_bytes = 2 * (in_dim * hid + hid * hid + hid * out_pad)   # bf16 slabs
    bias_bytes = 4 * (hid + hid + out_pad)                          # f32 biases

    # Rough VMEM footprint; raise the scoped limit so large tiles survive v5e's
    # 16 MiB default, but never above v7x's 64 MiB physical VMEM.
    n_wbuf = 1 if weight_bytes > (8 << 20) else 2
    est_vmem = (2 * tm * in_dim * 4                 # x tile (f32, double-buffered)
                + n_wbuf * (weight_bytes + bias_bytes)
                + 2 * tm * out_pad * 4)             # out tile (f32, double-buffered)
    vmem_limit = int(min(max(2 * est_vmem, 32 << 20), 64 << 20))

    cost = pl.CostEstimate(
        flops=2 * Bp * (in_dim * hid + hid * hid + hid * out_pad),
        transcendentals=0,
        bytes_accessed=(Bp * in_dim * 4 + weight_bytes + bias_bytes
                        + Bp * out_pad * 4),
    )

    out = pl.pallas_call(
        mlp_kernel,
        out_shape=jax.ShapeDtypeStruct((Bp, out_pad), jnp.float32),
        grid_spec=pltpu.PrefetchScalarGridSpec(
            num_scalar_prefetch=0,
            grid=grid,
            in_specs=[
                pl.BlockSpec((tm, in_dim), lambda i: (i, 0)),      # x tile (f32)
                _resident_spec((in_dim, hid), weight_bytes),       # w1 (bf16)
                _resident_spec((1, hid), weight_bytes),            # b1 (f32)
                _resident_spec((hid, hid), weight_bytes),          # w2 (bf16)
                _resident_spec((1, hid), weight_bytes),            # b2 (f32)
                _resident_spec((hid, out_pad), weight_bytes),      # w3 (bf16, padded)
                _resident_spec((1, out_pad), weight_bytes),        # b3 (f32, padded)
            ],
            out_specs=pl.BlockSpec((tm, out_pad), lambda i: (i, 0)),
        ),
        compiler_params=pltpu.CompilerParams(
            dimension_semantics=("parallel",),
            vmem_limit_bytes=vmem_limit),
        cost_estimate=cost,
    )(x, w1, b1, w2, b2, w3, b3)

    # Strip batch-row and output-column padding.
    return out[:B, :out_dim]


if __name__ == "__main__":
    # Small shapes consistent with the module's structure.
    batch, input_size, hidden_size, output_size = 16, 256, 128, 10

    key = jax.random.PRNGKey(0)
    kx, k1, k2, k3, kb1, kb2, kb3 = jax.random.split(key, 7)

    x = jax.random.normal(kx, (batch, input_size), dtype=jnp.float32)

    # Deterministic PyTorch nn.Linear-like init, stored as (in, out).
    def init_linear(kw, kb, fan_in, fan_out):
        bound = 1.0 / jnp.sqrt(fan_in)
        w = jax.random.uniform(kw, (fan_in, fan_out), jnp.float32, -bound, bound)
        b = jax.random.uniform(kb, (1, fan_out), jnp.float32, -bound, bound)
        return w, b

    w1, b1 = init_linear(k1, kb1, input_size, hidden_size)
    w2, b2 = init_linear(k2, kb2, hidden_size, hidden_size)
    w3, b3 = init_linear(k3, kb3, hidden_size, output_size)

    # One-time preprocessing (off the per-call path), then a jitted forward.
    params, out_dim = prepare_params(w1, b1, w2, b2, w3, b3)
    fwd = jax.jit(simple_model_forward, static_argnums=(2,))

    out = jax.block_until_ready(fwd(x, params, out_dim))
    assert out.shape == (batch, output_size)

    # Reference 1: same bf16-operand / f32-accumulate recipe (validates kernel math).
    def bf16(a):
        return a.astype(jnp.bfloat16).astype(jnp.float32)

    h = jnp.maximum(bf16(x) @ bf16(w1) + b1, 0.0)
    h = jnp.maximum(bf16(h) @ bf16(w2) + b2, 0.0)
    ref_bf16 = bf16(h) @ bf16(w3) + b3
    assert jnp.allclose(out, ref_bf16, atol=1e-2, rtol=1e-2), (
        f"bf16-recipe max abs err {jnp.max(jnp.abs(out - ref_bf16))}")

    # Reference 2: true f32 forward (bounds the bf16-operand rounding error
    # against the original f32 PyTorch semantics).
    hf = jnp.maximum(x @ w1 + b1, 0.0)
    hf = jnp.maximum(hf @ w2 + b2, 0.0)
    ref_f32 = hf @ w3 + b3
    assert jnp.allclose(out, ref_f32, atol=5e-2, rtol=5e-2), (
        f"f32 max abs err {jnp.max(jnp.abs(out - ref_f32))}")

    print("KERNEL_OK")
</pallas_src>

<mosaic_0001>
module attributes {stable_mosaic.version = 11 : i64} {
  func.func @mlp_kernel(%arg0: i32, %arg1: memref<16x256xf32, #tpu.memory_space<vmem>>, %arg2: memref<256x128xbf16, #tpu.memory_space<vmem>>, %arg3: memref<1x128xf32, #tpu.memory_space<vmem>>, %arg4: memref<128x128xbf16, #tpu.memory_space<vmem>>, %arg5: memref<1x128xf32, #tpu.memory_space<vmem>>, %arg6: memref<128x128xbf16, #tpu.memory_space<vmem>>, %arg7: memref<1x128xf32, #tpu.memory_space<vmem>>, %arg8: memref<16x128xf32, #tpu.memory_space<vmem>>) attributes {dimension_semantics = [#tpu.dimension_semantics<parallel>], iteration_bounds = array<i64: 1>, scalar_prefetch = 0 : i64, scratch_operands = 0 : i64, tpu.core_type = #tpu.core_type<tc>, window_params = [{transform_indices = @transform_0, window_bounds = array<i64: 16, 256>}, {pipeline_mode = #tpu.pipeline_mode<synchronous>, transform_indices = @transform_1, window_bounds = array<i64: 256, 128>}, {pipeline_mode = #tpu.pipeline_mode<synchronous>, transform_indices = @transform_2, window_bounds = array<i64: 1, 128>}, {pipeline_mode = #tpu.pipeline_mode<synchronous>, transform_indices = @transform_3, window_bounds = array<i64: 128, 128>}, {pipeline_mode = #tpu.pipeline_mode<synchronous>, transform_indices = @transform_4, window_bounds = array<i64: 1, 128>}, {pipeline_mode = #tpu.pipeline_mode<synchronous>, transform_indices = @transform_5, window_bounds = array<i64: 128, 128>}, {pipeline_mode = #tpu.pipeline_mode<synchronous>, transform_indices = @transform_6, window_bounds = array<i64: 1, 128>}, {transform_indices = @transform_7, window_bounds = array<i64: 16, 128>}]} {
    %c0 = arith.constant 0 : index
    %c0_0 = arith.constant 0 : index
    %0 = vector.load %arg1[%c0, %c0_0] : memref<16x256xf32, #tpu.memory_space<vmem>>, vector<16x256xf32>
    %1 = arith.truncf %0 : vector<16x256xf32> to vector<16x256xbf16>
    %c0_1 = arith.constant 0 : index
    %c0_2 = arith.constant 0 : index
    %2 = vector.load %arg2[%c0_1, %c0_2] : memref<256x128xbf16, #tpu.memory_space<vmem>>, vector<256x128xbf16>
    %cst = arith.constant dense<0.000000e+00> : vector<16x128xf32>
    %3 = tpu.matmul %1, %2, %cst {dimension_numbers = #tpu.dot_dimension_numbers<[1], [0], [0], [1], [0, 0, 1, 1], [], []>} : vector<16x256xbf16>, vector<256x128xbf16>, vector<16x128xf32> -> vector<16x128xf32>
    %c0_3 = arith.constant 0 : index
    %c0_4 = arith.constant 0 : index
    %4 = vector.load %arg3[%c0_3, %c0_4] : memref<1x128xf32, #tpu.memory_space<vmem>>, vector<1x128xf32>
    %5 = vector.broadcast %4 : vector<1x128xf32> to vector<16x128xf32>
    %6 = arith.addf %3, %5 : vector<16x128xf32>
    %cst_5 = arith.constant 0.000000e+00 : f32
    %7 = vector.broadcast %cst_5 : f32 to vector<16x128xf32>
    %8 = arith.maximumf %6, %7 : vector<16x128xf32>
    %9 = arith.truncf %8 : vector<16x128xf32> to vector<16x128xbf16>
    %c0_6 = arith.constant 0 : index
    %c0_7 = arith.constant 0 : index
    %10 = vector.load %arg4[%c0_6, %c0_7] : memref<128x128xbf16, #tpu.memory_space<vmem>>, vector<128x128xbf16>
    %cst_8 = arith.constant dense<0.000000e+00> : vector<16x128xf32>
    %11 = tpu.matmul %9, %10, %cst_8 {dimension_numbers = #tpu.dot_dimension_numbers<[1], [0], [0], [1], [0, 0, 1, 1], [], []>} : vector<16x128xbf16>, vector<128x128xbf16>, vector<16x128xf32> -> vector<16x128xf32>
    %c0_9 = arith.constant 0 : index
    %c0_10 = arith.constant 0 : index
    %12 = vector.load %arg5[%c0_9, %c0_10] : memref<1x128xf32, #tpu.memory_space<vmem>>, vector<1x128xf32>
    %13 = vector.broadcast %12 : vector<1x128xf32> to vector<16x128xf32>
    %14 = arith.addf %11, %13 : vector<16x128xf32>
    %cst_11 = arith.constant 0.000000e+00 : f32
    %15 = vector.broadcast %cst_11 : f32 to vector<16x128xf32>
    %16 = arith.maximumf %14, %15 : vector<16x128xf32>
    %17 = arith.truncf %16 : vector<16x128xf32> to vector<16x128xbf16>
    %c0_12 = arith.constant 0 : index
    %c0_13 = arith.constant 0 : index
    %18 = vector.load %arg6[%c0_12, %c0_13] : memref<128x128xbf16, #tpu.memory_space<vmem>>, vector<128x128xbf16>
    %cst_14 = arith.constant dense<0.000000e+00> : vector<16x128xf32>
    %19 = tpu.matmul %17, %18, %cst_14 {dimension_numbers = #tpu.dot_dimension_numbers<[1], [0], [0], [1], [0, 0, 1, 1], [], []>} : vector<16x128xbf16>, vector<128x128xbf16>, vector<16x128xf32> -> vector<16x128xf32>
    %c0_15 = arith.constant 0 : index
    %c0_16 = arith.constant 0 : index
    %20 = vector.load %arg7[%c0_15, %c0_16] : memref<1x128xf32, #tpu.memory_space<vmem>>, vector<1x128xf32>
    %21 = vector.broadcast %20 : vector<1x128xf32> to vector<16x128xf32>
    %22 = arith.addf %19, %21 : vector<16x128xf32>
    %c0_17 = arith.constant 0 : index
    %c0_18 = arith.constant 0 : index
    %23 = vector.load %arg8[%c0_17, %c0_18] : memref<16x128xf32, #tpu.memory_space<vmem>>, vector<16x128xf32>
    tpu.vector_store %arg8[%c0_17, %c0_18], %22 {strides = array<i32>} : memref<16x128xf32, #tpu.memory_space<vmem>>, vector<16x128xf32>,
    return
  }
  func.func @transform_0(%arg0: i32) -> (i32, i32) {
    %c0_i32 = arith.constant 0 : i32
    %c0_i32_0 = arith.constant 0 : i32
    return %arg0, %c0_i32 : i32, i32
  }
  func.func @transform_1(%arg0: i32) -> (i32, i32) {
    %c0_i32 = arith.constant 0 : i32
    %c0_i32_0 = arith.constant 0 : i32
    %c0_i32_1 = arith.constant 0 : i32
    return %c0_i32, %c0_i32_0 : i32, i32
  }
  func.func @transform_2(%arg0: i32) -> (i32, i32) {
    %c0_i32 = arith.constant 0 : i32
    %c0_i32_0 = arith.constant 0 : i32
    %c0_i32_1 = arith.constant 0 : i32
    return %c0_i32, %c0_i32_0 : i32, i32
  }
  func.func @transform_3(%arg0: i32) -> (i32, i32) {
    %c0_i32 = arith.constant 0 : i32
    %c0_i32_0 = arith.constant 0 : i32
    %c0_i32_1 = arith.constant 0 : i32
    return %c0_i32, %c0_i32_0 : i32, i32
  }
  func.func @transform_4(%arg0: i32) -> (i32, i32) {
    %c0_i32 = arith.constant 0 : i32
    %c0_i32_0 = arith.constant 0 : i32
    %c0_i32_1 = arith.constant 0 : i32
    return %c0_i32, %c0_i32_0 : i32, i32
  }
  func.func @transform_5(%arg0: i32) -> (i32, i32) {
    %c0_i32 = arith.constant 0 : i32
    %c0_i32_0 = arith.constant 0 : i32
    %c0_i32_1 = arith.constant 0 : i32
    return %c0_i32, %c0_i32_0 : i32, i32
  }
  func.func @transform_6(%arg0: i32) -> (i32, i32) {
    %c0_i32 = arith.constant 0 : i32
    %c0_i32_0 = arith.constant 0 : i32
    %c0_i32_1 = arith.constant 0 : i32
    return %c0_i32, %c0_i32_0 : i32, i32
  }
  func.func @transform_7(%arg0: i32) -> (i32, i32) {
    %c0_i32 = arith.constant 0 : i32
    %c0_i32_0 = arith.constant 0 : i32
    return %arg0, %c0_i32 : i32, i32
  }
}

</mosaic_0001>

<bundles_post_ra>
// kernel: simple_model_forward.1
= control target key start
LH: loop header
LB: loop body
LE: loop exit
PB: predicated region body
PF: predicated region fallthrough
CT: control target
= control target key end

     0   :  { %12 = vsyncpa [#allocation3], 0  ;;  %s888_s0 = inlined_call_operand.hbm [shape: f32[16,256], index: 0, kind: input, shape index: {}]   ;;  %s889_s1 = inlined_call_operand.hbm [shape: bf16[256,128], index: 1, kind: input, shape index: {}]   ;;  %s890_s2 = inlined_call_operand.vmem [shape: f32[1,128], index: 2, kind: input, shape index: {}]   ;;  %s891_s3 = inlined_call_operand.hbm [shape: bf16[128,128], index: 3, kind: input, shape index: {}]   ;;  %s892_s4 = inlined_call_operand.vmem [shape: f32[1,128], index: 4, kind: input, shape index: {}]   ;;  %s893_s5 = inlined_call_operand.hbm [shape: bf16[128,128], index: 5, kind: input, shape index: {}]   ;;  %s894_s6 = inlined_call_operand.vmem [shape: f32[1,128], index: 6, kind: input, shape index: {}]   ;;  %s895_s7 = inlined_call_operand.hbm [shape: f32[16,128], index: 7, kind: output, shape index: {}]  }
   0x1   :  { %13 = vsyncpa [#allocation6], 0 }
   0x2   :  { %14 = vsyncpa [#allocation9], 0 }
   0x3   :  { %15 = vsyncpa [#allocation4], 0  ;;  %s784_s24 = smov [#allocation5]  }
   0x4   :  { %s33_s25 = sshll.u32 %s784_s24, 4  ;;  %s34_s25 = int_to_ptr.vmem [resolvable:$true] %s33_s25 }
   0x5   :  { %s684_s26 = scalar_lea.vmem %s34_s25, 2048  ;;  %p689_p1 = scmp.lt.s32.totalorder %s34_s25, %s34_s25 }
   0x6   :  { %p685_p0 = scmp.ne.s32.totalorder %s34_s25, %s684_s26  ;;  %p690_p2 = scmp.lt.s32.totalorder %s684_s26, %s684_s26 }
   0x8   :  { %p691_p3 = por %p690_p2, %p689_p1 }
   0xa   :  { %p692_p4 = pnand %p691_p3, %p685_p0 }
   0xc   :  { %695 = shalt.err (!%p692_p4)
}
   0xd   :  { %s785_s27 = smov 64   ;;  %s786_s28 = smov 4  }
   0xe   :  { %39 = dma.hbm_to_vmem [thread:$0]  %s889_s1, 2048, %s34_s25, [#allocation6], %s785_s27, %s785_s27, %s786_s28  }
   0xf   :  { %s787_s8 = smov [#allocation2]  }
  0x10   :  { %s21_s9 = sshll.u32 %s787_s8, 4  ;;  %s22_s9 = int_to_ptr.vmem [resolvable:$true] %s21_s9 }
  0x11   :  { %s704_s10 = scalar_lea.vmem %s22_s9, 512  ;;  %p709_p6 = scmp.lt.s32.totalorder %s22_s9, %s22_s9 }
  0x12   :  { %p705_p5 = scmp.ne.s32.totalorder %s22_s9, %s704_s10  ;;  %p710_p7 = scmp.lt.s32.totalorder %s704_s10, %s704_s10 }
  0x14   :  { %p711_p8 = por %p710_p7, %p709_p6 }
  0x16   :  { %p712_p9 = pnand %p711_p8, %p705_p5 }
  0x18   :  { %715 = shalt.err (!%p712_p9)
}
  0x19   :  { %s788_s11 = smov 256   ;;  %s789_s12 = smov 16  }
  0x1a   :  { %27 = dma.hbm_to_vmem [thread:$0]  %s888_s0, 512, %s22_s9, [#allocation3], %s788_s11, %s788_s11, %s789_s12  }
  0x1b   :  { %s790_s15 = smov [#allocation7]   ;;  %s791_s17 = smov [#allocation8]  }
  0x1c   :  { %s47_s16 = sshll.u32 %s790_s15, 4  ;;  %s61_s1 = sshll.u32 %s791_s17, 4  ;;  %s48_s16 = int_to_ptr.vmem [resolvable:$true] %s47_s16  ;;  %s62_s1 = int_to_ptr.vmem [resolvable:$true] %s61_s1 }
  0x1d   :  { %s724_s18 = scalar_lea.vmem %s48_s16, 1024  ;;  %p729_p11 = scmp.lt.s32.totalorder %s48_s16, %s48_s16 }
  0x1e   :  { %p725_p10 = scmp.ne.s32.totalorder %s48_s16, %s724_s18  ;;  %p730_p12 = scmp.lt.s32.totalorder %s724_s18, %s724_s18 }
  0x20   :  { %p731_p13 = por %p730_p12, %p729_p11 }
  0x22   :  { %p732_p0 = pnand %p731_p13, %p725_p10 }
  0x24   :  { %735 = shalt.err (!%p732_p0)
}
  0x25   :  { %53 = dma.hbm_to_vmem [thread:$0]  %s891_s3, 1024, %s48_s16, [#allocation6], %s785_s27, %s785_s27, %s786_s28  }
  0x26   :  { %s744_s0 = scalar_lea.vmem %s62_s1, 1024  ;;  %p749_p2 = scmp.lt.s32.totalorder %s62_s1, %s62_s1 }
  0x27   :  { %p745_p1 = scmp.ne.s32.totalorder %s62_s1, %s744_s0  ;;  %p750_p3 = scmp.lt.s32.totalorder %s744_s0, %s744_s0 }
  0x29   :  { %p751_p4 = por %p750_p3, %p749_p2 }
  0x2b   :  { %p752_p5 = pnand %p751_p4, %p745_p1 }
  0x2d   :  { %755 = shalt.err (!%p752_p5)
}
  0x2e   :  { %67 = dma.hbm_to_vmem [thread:$0]  %s893_s5, 1024, %s62_s1, [#allocation9], %s785_s27, %s785_s27, %s786_s28  }
  0x2f   :  { %776 = dma.done.wait [#allocation3], 512  }
  0x30   :  { %777 = vsyncadd [#allocation3], 4294966784 }
  0x31   :  { %778 = dma.done.wait [#allocation6], 3072  }
  0x32   :  { %779 = vsyncadd [#allocation6], 4294964224 }
  0x33   :  { %780 = dma.done.wait [#allocation9], 1024  }
  0x34   :  { %781 = vsyncadd [#allocation9], 4294966272  ;;  %v792_v0 = vmov 0.0   ;;  %v644_v1 = vld [vmem:[#allocation5 + $0x78] sm:$0xff]   ;;  %v646_v3 = vld [vmem:[#allocation5 + $0x70] sm:$0xff]   ;;  %vm793_vm0 = vmmov 0  }
  0x35   :  { %591 = vmatprep.subr.bf16.mxu1 %v792_v0  ;;  %v645_v2 = vld [vmem:[#allocation5 + $0x38] sm:$0xff]   ;;  %551 = vmatprep.subr.bf16.mxu0 %v644_v1  ;;  %v647_v4 = vld [vmem:[#allocation5 + $0x30] sm:$0xff]   ;;  %v648_v5 = vld [vmem:[#allocation5 + $0x68] sm:$0xff]   ;;  %s794_s26 = smov [#allocation10]  }
  0x36   :  { %552 = vmatpush3.bf16.msra.mxu0 %v645_v2  ;;  %v649_v6 = vld [vmem:[#allocation5 + $0x28] sm:$0xff]   ;;  %v650_v7 = vld [vmem:[#allocation5 + $0x60] sm:$0xff]   ;;  %v652_v9 = vld [vmem:[#allocation5 + $0x58] sm:$0xff]   ;;  %607 = vmatprep.mubr.msk.bf16.mxu1 %vm793_vm0, %v792_v0  ;;  %s502_s27 = sshll.u32 %s794_s26, 4  ;;  %s503_s27 = int_to_ptr.vmem [resolvable:$true] %s502_s27 }
  0x37   :  { %553 = vmatprep.subr.bf16.mxu0 %v646_v3  ;;  %v651_v8 = vld [vmem:[#allocation5 + $0x20] sm:$0xff]   ;;  %v653_v10 = vld [vmem:[#allocation5 + $0x18] sm:$0xff]   ;;  %v654_v11 = vld [vmem:[#allocation5 + $0x50] sm:$0xff]   ;;  %p761_p7 = scmp.lt.s32.totalorder %s503_s27, %s503_s27 }
  0x38   :  { %v84_v12 = vld [vmem:[#allocation2 + $0x8] sm:$0xff]  ;;  %v86_v13 = vld [vmem:[#allocation2 + $0x18] sm:$0xff]  ;;  %v655_v14 = vld [vmem:[#allocation5 + $0x10] sm:$0xff]  }
  0x39   :  { %v88_v15 = vpack.c.bf16 %v86_v13, %v84_v12  ;;  %v660_v16 = vld [vmem:[#allocation7 + $0x38] sm:$0xff]   ;;  %v656_v17 = vld [vmem:[#allocation5 + $0x48] sm:$0xff]   ;;  %v661_v18 = vld [vmem:[#allocation7 + $0x30] sm:$0xff]  }
  0x3a   :  { %554 = vmatpush3.bf16.msra.mxu0 %v647_v4  ;;  %592 = vmatpush3.bf16.msra.mxu1 %v660_v16  ;;  %v657_v19 = vld [vmem:[#allocation5 + $0x8] sm:$0xff]   ;;  %v658_v20 = vld [vmem:[#allocation5 + $0x40] sm:$0xff]   ;;  %v85_v24 = vld [vmem:[#allocation2 + $0x10] sm:$0xff] }
  0x3b   :  { %555 = vmatprep.subr.bf16.mxu0 %v648_v5  ;;  %256 = vmatprep.mubr.bf16.mxu0 %v88_v15  ;;  %v662_v21 = vld [vmem:[#allocation7 + $0x28] sm:$0xff]   ;;  %v659_v22 = vld [vmem:[#allocation5] sm:$0xff]   ;;  %v664_v27 = vld [vmem:[#allocation7 + $0x18] sm:$0xff]  }
  0x3c   :  { %593 = vmatprep.subr.bf16.mxu1 %v792_v0  ;;  %v83_v23 = vld [vmem:[#allocation2] sm:$0xff]  ;;  %v665_v28 = vld [vmem:[#allocation7 + $0x10] sm:$0xff]   ;;  %v666_v29 = vld [vmem:[#allocation7 + $0x8] sm:$0xff]  }
  0x3d   :  { %v663_v25 = vld [vmem:[#allocation7 + $0x20] sm:$0xff]   ;;  %v87_v26 = vpack.c.bf16 %v85_v24, %v83_v23  ;;  %v668_v31 = vld [vmem:[#allocation8 + $0x38] sm:$0xff]   ;;  %v669_v32 = vld [vmem:[#allocation8 + $0x30] sm:$0xff]  }
  0x3e   :  { %556 = vmatpush3.bf16.msra.mxu0 %v649_v6  ;;  %594 = vmatpush3.bf16.msra.mxu1 %v661_v18  ;;  %v667_v30 = vld [vmem:[#allocation7] sm:$0xff]   ;;  %v670_v33 = vld [vmem:[#allocation8 + $0x28] sm:$0xff]   ;;  %v672_v35 = vld [vmem:[#allocation8 + $0x18] sm:$0xff]  }
  0x3f   :  { %557 = vmatprep.subr.bf16.mxu0 %v650_v7  ;;  %595 = vmatprep.subr.bf16.mxu1 %v792_v0  ;;  %v671_v34 = vld [vmem:[#allocation8 + $0x20] sm:$0xff]   ;;  %v673_v48 = vld [vmem:[#allocation8 + $0x10] sm:$0xff]   ;;  %v674_v49 = vld [vmem:[#allocation8 + $0x8] sm:$0xff]  }
  0x40   :  { %v516_v39 = vld [vmem:[%s890_s2] ss:$0 sm:$0xff] }
  0x41   :  { %v675_v50 = vld [vmem:[#allocation8] sm:$0xff]  }
  0x42   :  { %558 = vmatpush3.bf16.msra.mxu0 %v651_v8  ;;  %596 = vmatpush3.bf16.msra.mxu1 %v662_v21  ;;  %v533_v51 = vld [vmem:[%s892_s4] ss:$0 sm:$0xff]  ;;  %s756_s4 = scalar_lea.vmem %s503_s27, 256 }
  0x43   :  { %559 = vmatprep.subr.bf16.mxu0 %v652_v9  ;;  %597 = vmatprep.subr.bf16.mxu1 %v792_v0  ;;  %v542_v61 = vld [vmem:[%s894_s6] ss:$0 sm:$0xff]  ;;  %p757_p6 = scmp.ne.s32.totalorder %s503_s27, %s756_s4  ;;  %p762_p8 = scmp.lt.s32.totalorder %s756_s4, %s756_s4 }
  0x45   :  { %p763_p9 = por %p762_p8, %p761_p7 }
  0x46   :  { %560 = vmatpush3.bf16.msra.mxu0 %v653_v10  ;;  %598 = vmatpush3.bf16.msra.mxu1 %v663_v25 }
  0x47   :  { %561 = vmatprep.subr.bf16.mxu0 %v654_v11  ;;  %599 = vmatprep.subr.bf16.mxu1 %v792_v0  ;;  %p764_p10 = pnand %p763_p9, %p757_p6 }
  0x4a   :  { %562 = vmatpush3.bf16.msra.mxu0 %v655_v14  ;;  %600 = vmatpush3.bf16.msra.mxu1 %v664_v27 }
  0x4b   :  { %563 = vmatprep.subr.bf16.mxu0 %v656_v17  ;;  %601 = vmatprep.subr.bf16.mxu1 %v792_v0 }
  0x4e   :  { %564 = vmatpush3.bf16.msra.mxu0 %v657_v19  ;;  %602 = vmatpush3.bf16.msra.mxu1 %v665_v28 }
  0x4f   :  { %565 = vmatprep.subr.bf16.mxu0 %v658_v20  ;;  %603 = vmatprep.subr.bf16.mxu1 %v792_v0 }
  0x52   :  { %566 = vmatpush3.bf16.msra.mxu0 %v659_v22  ;;  %604 = vmatpush3.bf16.msra.mxu1 %v666_v29 }
  0x53   :  { %611 = vmatprep.subr.bf16.mxu0 %v792_v0  ;;  %605 = vmatprep.subr.bf16.mxu1 %v792_v0 }
  0x55   :  { %257 = vmatmul.mubr.bf16.vlgmr.msra.gmra.mxu0 %v87_v26 }
  0x56   :  { %606 = vmatpush3.bf16.msra.mxu1 %v667_v30  ;;  %627 = vmatprep.mubr.msk.bf16.mxu0 %vm793_vm0, %v792_v0 }
  0x57   :  { %612 = vmatpush3.bf16.msra.mxu0 %v668_v31 }
  0x58   :  { %613 = vmatprep.subr.bf16.mxu0 %v792_v0 }
  0x5b   :  { %614 = vmatpush3.bf16.msra.mxu0 %v669_v32 }
  0x5c   :  { %615 = vmatprep.subr.bf16.mxu0 %v792_v0 }
  0x5f   :  { %616 = vmatpush3.bf16.msra.mxu0 %v670_v33 }
  0x60   :  { %617 = vmatprep.subr.bf16.mxu0 %v792_v0 }
  0x63   :  { %618 = vmatpush3.bf16.msra.mxu0 %v671_v34 }
  0x64   :  { %619 = vmatprep.subr.bf16.mxu0 %v792_v0 }
  0x67   :  { %620 = vmatpush3.bf16.msra.mxu0 %v672_v35 }
  0x68   :  { %621 = vmatprep.subr.bf16.mxu0 %v792_v0 }
  0x6b   :  { %622 = vmatpush3.bf16.msra.mxu0 %v673_v48 }
  0x6c   :  { %623 = vmatprep.subr.bf16.mxu0 %v792_v0 }
  0x6f   :  { %624 = vmatpush3.bf16.msra.mxu0 %v674_v49 }
  0x70   :  { %625 = vmatprep.subr.bf16.mxu0 %v792_v0 }
  0x73   :  { %626 = vmatpush3.bf16.msra.mxu0 %v675_v50 }
 0x115   :  { %v567_v36 = vpop.f32.mrf.mxu0 }
 0x117   :  { %v568_v37 = vpop.f32.mrf.mxu0 }
 0x118   :  { %v569_v38 = vadd.f32 %v568_v37, %v567_v36 }
 0x119   :  { %v570_v40 = vpop.f32.mrf.mxu0 }
 0x11a   :  { %v259_v42 = vadd.f32 %v569_v38, %v516_v39 }
 0x11b   :  { %v571_v41 = vpop.f32.mrf.mxu0 }
 0x11c   :  { %v572_v43 = vadd.f32 %v571_v41, %v570_v40  ;;  %v265_v45 = vmax.f32 %v259_v42, 0.0 }
 0x11e   :  { %v262_v44 = vadd.f32 %v572_v43, %v516_v39 }
 0x120   :  { %v266_v46 = vmax.f32 %v262_v44, 0.0 }
 0x122   :  { %v267_v47 = vpack.c.bf16 %v266_v46, %v265_v45 }
 0x124   :  { %608 = vmatmul.mubr.bf16.vlgmr.msra.gmra.mxu1 %v267_v47 }
 0x1e4   :  { %v373_v52 = vpop.f32.mrf.mxu1 }
 0x1e5   :  { %v374_v54 = vadd.f32 %v533_v51, %v373_v52 }
 0x1e6   :  { %v609_v53 = vpop.f32.mrf.mxu1 }
 0x1e7   :  { %v380_v58 = vmax.f32 %v374_v54, 0.0 }
 0x1e8   :  { %v376_v55 = vpop.f32.mrf.mxu1 }
 0x1e9   :  { %v377_v56 = vadd.f32 %v533_v51, %v376_v55 }
 0x1ea   :  { %v610_v57 = vpop.f32.mrf.mxu1 }
 0x1eb   :  { %v381_v59 = vmax.f32 %v377_v56, 0.0 }
 0x1ed   :  { %v382_v60 = vpack.c.bf16 %v381_v59, %v380_v58 }
 0x1ef   :  { %628 = vmatmul.mubr.bf16.vlgmr.msra.gmra.mxu0 %v382_v60 }
 0x2af   :  { %v488_v62 = vpop.f32.mrf.mxu0 }
 0x2b0   :  { %v489_v63 = vadd.f32 %v542_v61, %v488_v62 }
 0x2b1   :  { %v629_v0 = vpop.f32.mrf.mxu0 }
 0x2b2   :  { %495 = vst [vmem:[#allocation10] sm:$0xff] %v489_v63 }
 0x2b3   :  { %v491_v1 = vpop.f32.mrf.mxu0 }
 0x2b4   :  { %v492_v2 = vadd.f32 %v542_v61, %v491_v1 }
 0x2b5   :  { %v630_v3 = vpop.f32.mrf.mxu0 }
 0x2b6   :  { %496 = vst [vmem:[#allocation10 + $0x8] sm:$0xff] %v492_v2 }
 0x2b7   :  { %767 = shalt.err (!%p764_p10)
}
 0x2b8   :  { %s795_s28 = smov 128   ;;  %s796_s6 = smov 8  }
 0x2b9   :  { %508 = dma.vmem_to_hbm [thread:$0]  %s503_s27, 256, %s895_s7, [#allocation4], %s795_s28, %s795_s28, %s796_s6  }
 0x2ba   :  { %782 = dma.done.wait [#allocation4], 256  }
 0x2bb   :  { %783 = vsyncadd [#allocation4], 4294967040 }
 0x2bc   :  { %512 = vsyncpa [#allocation3], 1 }
 0x2bd   :  { %513 = vsyncpa [#allocation6], 1 }
 0x2be   :  { %514 = vsyncpa [#allocation9], 1 }
 0x2bf   :  { %515 = vsyncpa [#allocation4], 1 }

</bundles_post_ra>
